<compile_context>
chip_gen: v7x
topology: tpu7x:2x2x1
jax: 0.10.0
libtpu: 0.0.40
codegen_flags: <defaults>
</compile_context>

<pallas_src>
import functools

import jax
import jax.numpy as jnp
from jax.experimental import pallas as pl
from jax.experimental.pallas import tpu as pltpu

NEG_SLOPE = 0.01      # F.leaky_relu default
_SLACK = 2 << 20      # headroom for compiler-internal VMEM scratch


def _round_up(v: int, m: int) -> int:
    return ((v + m - 1) // m) * m


def _vmem_budget_bytes() -> int:
    """Usable per-core VMEM budget (generation aware: 64 MiB/TC on v7x,
    128 MiB on v5e/v6e), leaving ~25% headroom for the compiler."""
    try:
        cap = int(pltpu.get_tpu_info().vmem_capacity_bytes)
    except Exception:
        cap = 64 << 20    # conservative default (v7x per-TensorCore)
    return (cap * 3) // 4


# --------------------------------------------------------------------------
# Kernels
# --------------------------------------------------------------------------
def _conv1d_lrelu_kernel(x_ref, w_ref, o_ref, *, k: int, l_tile: int):
    """Large-L path: one lane-dense L tile of one batch element per step.

    x_ref: (1, C_in, L_in_pad)  -- per-batch slab, resident across L tiles
    w_ref: (C_out, K*C_in)      -- im2col weight (single-buffered)
    o_ref: (1, C_out, L_TILE)   -- lane-dense output tile
    """
    t = pl.program_id(1)
    start = pl.multiple_of(t * l_tile, 128)
    x_win = x_ref[0, :, pl.ds(start, l_tile + k - 1)]          # (C_in, L_TILE+K-1)
    # im2col patch matrix: patches[kk*C_in + ci, l] = x[ci, l + kk].
    # (Alternative if the vst slot saturates for very large K on v5e:
    #  accumulate K dots of (C_out, C_in) @ shifted views instead.)
    patches = jnp.concatenate(
        [x_win[:, kk:kk + l_tile] for kk in range(k)], axis=0)  # (K*C_in, L_TILE)
    acc = jnp.dot(w_ref[...], patches,
                  preferred_element_type=jnp.float32)           # (C_out, L_TILE) f32
    y = jnp.maximum(acc, NEG_SLOPE * acc)                       # LeakyReLU
    o_ref[0] = y.astype(o_ref.dtype)


def _conv1d_lrelu_packed_kernel(x_ref, w_ref, o_ref, *, k: int, b_tile: int,
                                l_out: int):
    """Small-L path: B_TILE batch elements packed along the lane axis.

    x_ref: (B_TILE, C_in, L)            w_ref: (C_out, K*C_in)
    o_ref: (1, C_out, B_TILE * L_out)   -- lane-dense packed output
    """
    rows = []
    for kk in range(k):
        rows.append(jnp.concatenate(
            [x_ref[b, :, kk:kk + l_out] for b in range(b_tile)], axis=1))
    patches = jnp.concatenate(rows, axis=0)          # (K*C_in, B_TILE*L_out)
    acc = jnp.dot(w_ref[...], patches, preferred_element_type=jnp.float32)
    y = jnp.maximum(acc, NEG_SLOPE * acc)
    o_ref[0] = y.astype(o_ref.dtype)


# --------------------------------------------------------------------------
# VMEM accounting
# --------------------------------------------------------------------------
def _large_l_vmem_bytes(l_tile, l_cols, c_in, c_out, k, in_item, out_item):
    """Estimated VMEM for one large-L pallas_call covering l_cols output cols."""
    n_t = -(-l_cols // l_tile)
    l_in_pad = n_t * l_tile + k - 1
    x_res = _round_up(c_in, 8) * _round_up(l_in_pad, 128) * in_item        # Buffered(1)
    w_blk = _round_up(c_out, 8) * _round_up(k * c_in, 128) * in_item       # Buffered(1)
    o_blk = 2 * _round_up(c_out, 8) * l_tile * out_item                    # double buffered
    tmp = 2 * (_round_up(k * c_in, 8) + _round_up(c_out, 8)) * l_tile * 4  # patches + acc
    return x_res + w_blk + o_blk + tmp


# --------------------------------------------------------------------------
# pallas_call wrappers
# --------------------------------------------------------------------------
def _conv1d_large_l(x, w2d, *, k, l_tile, out_dtype, budget):
    """One pallas_call over the whole (already compute-dtype) x, L_out >= 128."""
    n, c_in, l = x.shape
    c_out = w2d.shape[0]
    l_out = l - k + 1
    num_tiles = pl.cdiv(l_out, l_tile)
    l_out_pad = num_tiles * l_tile
    l_in_pad = l_out_pad + k - 1
    if l_in_pad > l:
        # At most one tile of pad, written at the narrow compute dtype.
        # TODO(synk): handle the ragged tail in-kernel (clamped window) to
        # avoid this extra HBM pass entirely for very large x.
        x = jnp.pad(x, ((0, 0), (0, 0), (0, l_in_pad - l)))

    in_item = jnp.dtype(x.dtype).itemsize
    out_item = jnp.dtype(out_dtype).itemsize
    needed = _large_l_vmem_bytes(l_tile, l_out, c_in, c_out, k, in_item,
                                 out_item) + _SLACK
    vmem_limit = int(min(budget, max(needed, 32 << 20)))

    cost = pl.CostEstimate(
        flops=2 * n * c_out * c_in * k * l_out_pad,
        transcendentals=0,
        bytes_accessed=(n * c_in * l_in_pad * in_item
                        + c_out * k * c_in * in_item
                        + n * c_out * l_out_pad * out_item))

    # Megacore: shard the batch axis when there is one; sharding L would make
    # both cores DMA the full per-batch x slab.
    dims = ("parallel", "arbitrary") if n >= 2 else ("arbitrary", "parallel")

    kernel = functools.partial(_conv1d_lrelu_kernel, k=k, l_tile=l_tile)
    out_pad = pl.pallas_call(
        kernel,
        out_shape=jax.ShapeDtypeStruct((n, c_out, l_out_pad), out_dtype),
        grid=(n, num_tiles),
        in_specs=[
            # Per-batch slab, resident across the inner L-tile axis; its block
            # index only changes with the batch axis -> single-buffered.
            pl.BlockSpec((1, c_in, l_in_pad), lambda i, t: (i, 0, 0),
                         pipeline_mode=pl.Buffered(1)),
            # Weight never changes -> single-buffered.
            pl.BlockSpec((c_out, k * c_in), lambda i, t: (0, 0),
                         pipeline_mode=pl.Buffered(1)),
        ],
        out_specs=pl.BlockSpec((1, c_out, l_tile), lambda i, t: (i, 0, t)),
        compiler_params=pltpu.CompilerParams(
            dimension_semantics=dims, vmem_limit_bytes=vmem_limit),
        cost_estimate=cost,
    )(x, w2d)
    return out_pad[:, :, :l_out]


def _conv1d_small_l(x, w2d, *, k, out_dtype, budget):
    """L_out < 128: pack B_TILE batch elements along the lane axis so the
    writeback DMA and the matmul's N dimension are lane-dense."""
    n, c_in, l = x.shape
    c_out = w2d.shape[0]
    l_out = l - k + 1

    b_tile = min(n, max(1, 512 // l_out), max(1, 128 // k), 64)
    b_tile = max(1, b_tile)
    num_b_tiles = pl.cdiv(n, b_tile)
    n_pad = num_b_tiles * b_tile
    if n_pad > n:
        x = jnp.pad(x, ((0, n_pad - n), (0, 0), (0, 0)))
    lanes = b_tile * l_out

    in_item = jnp.dtype(x.dtype).itemsize
    out_item = jnp.dtype(out_dtype).itemsize
    lanes_pad = _round_up(lanes, 128)
    needed = (2 * b_tile * _round_up(c_in, 8) * _round_up(l, 128) * in_item
              + _round_up(c_out, 8) * _round_up(k * c_in, 128) * in_item
              + 2 * _round_up(c_out, 8) * lanes_pad * out_item
              + 2 * (_round_up(k * c_in, 8) + _round_up(c_out, 8)) * lanes_pad * 4
              + _SLACK)
    vmem_limit = int(min(budget, max(needed, 32 << 20)))

    cost = pl.CostEstimate(
        flops=2 * n_pad * c_out * c_in * k * l_out,
        transcendentals=0,
        bytes_accessed=(n_pad * c_in * l * in_item
                        + c_out * k * c_in * in_item
                        + n_pad * c_out * l_out * out_item))

    kernel = functools.partial(_conv1d_lrelu_packed_kernel, k=k,
                               b_tile=b_tile, l_out=l_out)
    out_packed = pl.pallas_call(
        kernel,
        out_shape=jax.ShapeDtypeStruct((num_b_tiles, c_out, lanes), out_dtype),
        grid=(num_b_tiles,),
        in_specs=[
            pl.BlockSpec((b_tile, c_in, l), lambda bt: (bt, 0, 0)),
            pl.BlockSpec((c_out, k * c_in), lambda bt: (0, 0),
                         pipeline_mode=pl.Buffered(1)),
        ],
        out_specs=pl.BlockSpec((1, c_out, lanes), lambda bt: (bt, 0, 0)),
        compiler_params=pltpu.CompilerParams(
            dimension_semantics=("parallel",), vmem_limit_bytes=vmem_limit),
        cost_estimate=cost,
    )(x, w2d)

    # (num_b_tiles, C_out, B_TILE*L_out) -> (N, C_out, L_out)
    out = out_packed.reshape(num_b_tiles, c_out, b_tile, l_out)
    out = jnp.transpose(out, (0, 2, 1, 3)).reshape(n_pad, c_out, l_out)
    return out[:n]


def basic_conv1d(x, weight, *, use_bf16_inputs=True, l_tile=None,
                 max_resident_cols=None):
    """x: (N, C_in, L); weight: (C_out, C_in, K).
    Returns leaky_relu(conv1d(x, weight), 0.01) of shape (N, C_out, L-K+1).

    use_bf16_inputs: feed bf16 to the MXU (f32 accumulation).  Set False for
    exact f32-input parity with the PyTorch f32 module.
    """
    n, c_in, l = x.shape
    c_out, c_in_w, k = weight.shape
    assert c_in_w == c_in
    l_out = l - k + 1
    assert l_out >= 1

    out_dtype = x.dtype
    compute_dtype = jnp.bfloat16 if use_bf16_inputs else x.dtype
    in_item = jnp.dtype(compute_dtype).itemsize
    out_item = jnp.dtype(out_dtype).itemsize
    budget = _vmem_budget_bytes()

    # Cast before any padding so padded copies are written at the narrow width.
    xc = x.astype(compute_dtype)
    # 2-D im2col weight layout: w2d[co, kk*C_in + ci] = weight[co, ci, kk]
    w2d = jnp.transpose(weight, (0, 2, 1)).reshape(c_out, k * c_in)
    w2d = w2d.astype(compute_dtype)

    # ---- small-L path: per-batch padding to 128 lanes would waste the vregs,
    # the writeback DMA and the MXU N dim -> pack batches onto the lane axis.
    if l_out < 128:
        return _conv1d_small_l(xc, w2d, k=k, out_dtype=out_dtype, budget=budget)

    # ---- large-L path: lane-dense L tiles, per-batch resident x slab.
    if l_tile is None:
        l_tile = 128
        for cand in range(min(2048, _round_up(l_out, 128)), 127, -128):
            if (_large_l_vmem_bytes(cand, l_out, c_in, c_out, k, in_item,
                                    out_item) + _SLACK <= budget):
                l_tile = cand
                break
    l_tile = _round_up(l_tile, 128)

    if max_resident_cols is None:
        if (_large_l_vmem_bytes(l_tile, l_out, c_in, c_out, k, in_item,
                                out_item) + _SLACK <= budget):
            max_resident_cols = l_out
        else:
            # Largest multiple of l_tile whose resident x window still fits
            # (hit for huge L on v7x's 64 MiB VMEM).
            max_resident_cols = l_tile
            while (max_resident_cols + l_tile < l_out
                   and _large_l_vmem_bytes(l_tile, max_resident_cols + l_tile,
                                           c_in, c_out, k, in_item,
                                           out_item) + _SLACK <= budget):
                max_resident_cols += l_tile

    if l_out <= max_resident_cols:
        return _conv1d_large_l(xc, w2d, k=k, l_tile=l_tile,
                               out_dtype=out_dtype, budget=budget)

    # Resident-x slab overflows this generation's VMEM budget: process L in
    # wrapper-level chunks, each overlapping the next by K-1 columns.
    # TODO(synk): replace with in-kernel manual halo-window DMA (P4 pattern)
    # to avoid the per-chunk slice copy of x.
    l_chunk = max(l_tile, (max_resident_cols // l_tile) * l_tile)
    outs = []
    for c0 in range(0, l_out, l_chunk):
        cols = min(l_chunk, l_out - c0)
        xs = jax.lax.slice_in_dim(xc, c0, min(c0 + cols + k - 1, l), axis=2)
        outs.append(_conv1d_large_l(xs, w2d, k=k, l_tile=l_tile,
                                    out_dtype=out_dtype, budget=budget))
    return jnp.concatenate(outs, axis=2)


def reference(x, weight):
    y = jax.lax.conv_general_dilated(
        x, weight, window_strides=(1,), padding="VALID",
        dimension_numbers=("NCH", "OIH", "NCH"))
    return jnp.where(y > 0, y, NEG_SLOPE * y)


if __name__ == "__main__":
    def make_inputs(key, n, c_in, c_out, l, k):
        kx, kw = jax.random.split(key)
        x = jax.random.normal(kx, (n, c_in, l), dtype=jnp.float32)
        fan_in = c_in * k
        bound = (1.0 / fan_in) ** 0.5
        w = jax.random.uniform(kw, (c_out, c_in, k), dtype=jnp.float32,
                               minval=-bound, maxval=bound)
        return x, w

    k1, k2 = jax.random.split(jax.random.PRNGKey(0))

    # 1) Module-scale shapes (N=2, C_in=4, C_out=8, L=16, K=3): L_out = 14,
    #    exercises the batch-packed small-L path (bf16 default and f32 opt-in).
    x1, w1 = make_inputs(k1, 2, 4, 8, 16, 3)
    ref1 = reference(x1, w1)
    out1_bf16 = jax.block_until_ready(basic_conv1d(x1, w1))
    out1_f32 = jax.block_until_ready(basic_conv1d(x1, w1, use_bf16_inputs=False))
    assert out1_bf16.shape == (2, 8, 14)
    assert jnp.allclose(out1_bf16, ref1, rtol=5e-2, atol=5e-2), \
        float(jnp.max(jnp.abs(out1_bf16 - ref1)))
    assert jnp.allclose(out1_f32, ref1, rtol=1e-5, atol=1e-5), \
        float(jnp.max(jnp.abs(out1_f32 - ref1)))

    # 2) Larger L: lane-dense tiled path, plus the chunked-L fallback forced
    #    via max_resident_cols (the v7x overflow path).
    x2, w2 = make_inputs(k2, 2, 8, 16, 384, 5)
    ref2 = reference(x2, w2)
    out2 = jax.block_until_ready(basic_conv1d(x2, w2))
    out2_chunked = jax.block_until_ready(
        basic_conv1d(x2, w2, l_tile=128, max_resident_cols=128))
    assert out2.shape == (2, 16, 380)
    assert jnp.allclose(out2, ref2, rtol=5e-2, atol=5e-2), \
        float(jnp.max(jnp.abs(out2 - ref2)))
    assert jnp.allclose(out2_chunked, ref2, rtol=5e-2, atol=5e-2), \
        float(jnp.max(jnp.abs(out2_chunked - ref2)))

    print("KERNEL_OK")
</pallas_src>

<mosaic_0001>
module attributes {stable_mosaic.version = 11 : i64} {
  func.func @_conv1d_lrelu_packed_kernel(%arg0: i32, %arg1: memref<2x4x16xbf16, #tpu.memory_space<vmem>>, %arg2: memref<8x12xbf16, #tpu.memory_space<vmem>>, %arg3: memref<1x8x28xf32, #tpu.memory_space<vmem>>) attributes {dimension_semantics = [#tpu.dimension_semantics<parallel>], iteration_bounds = array<i64: 1>, scalar_prefetch = 0 : i64, scratch_operands = 0 : i64, tpu.core_type = #tpu.core_type<tc>, window_params = [{transform_indices = @transform_0, window_bounds = array<i64: 2, 4, 16>}, {pipeline_mode = #tpu.pipeline_mode<synchronous>, transform_indices = @transform_1, window_bounds = array<i64: 8, 12>}, {transform_indices = @transform_2, window_bounds = array<i64: 1, 8, 28>}]} {
    %c0 = arith.constant 0 : index
    %c0_0 = arith.constant 0 : index
    %c0_1 = arith.constant 0 : index
    %0 = vector.load %arg1[%c0, %c0_0, %c0_1] : memref<2x4x16xbf16, #tpu.memory_space<vmem>>, vector<1x4x14xbf16>
    %1 = vector.shape_cast %0 : vector<1x4x14xbf16> to vector<4x14xbf16>
    %c1 = arith.constant 1 : index
    %c0_2 = arith.constant 0 : index
    %c0_3 = arith.constant 0 : index
    %2 = vector.load %arg1[%c1, %c0_2, %c0_3] : memref<2x4x16xbf16, #tpu.memory_space<vmem>>, vector<1x4x14xbf16>
    %3 = vector.shape_cast %2 : vector<1x4x14xbf16> to vector<4x14xbf16>
    %4 = tpu.concatenate %1, %3 in 1 : vector<4x14xbf16>, vector<4x14xbf16> -> vector<4x28xbf16>
    %c0_4 = arith.constant 0 : index
    %c0_5 = arith.constant 0 : index
    %c1_6 = arith.constant 1 : index
    %5 = vector.load %arg1[%c0_4, %c0_5, %c1_6] : memref<2x4x16xbf16, #tpu.memory_space<vmem>>, vector<1x4x14xbf16>
    %6 = vector.shape_cast %5 : vector<1x4x14xbf16> to vector<4x14xbf16>
    %c1_7 = arith.constant 1 : index
    %c0_8 = arith.constant 0 : index
    %c1_9 = arith.constant 1 : index
    %7 = vector.load %arg1[%c1_7, %c0_8, %c1_9] : memref<2x4x16xbf16, #tpu.memory_space<vmem>>, vector<1x4x14xbf16>
    %8 = vector.shape_cast %7 : vector<1x4x14xbf16> to vector<4x14xbf16>
    %9 = tpu.concatenate %6, %8 in 1 : vector<4x14xbf16>, vector<4x14xbf16> -> vector<4x28xbf16>
    %c0_10 = arith.constant 0 : index
    %c0_11 = arith.constant 0 : index
    %c2 = arith.constant 2 : index
    %10 = vector.load %arg1[%c0_10, %c0_11, %c2] : memref<2x4x16xbf16, #tpu.memory_space<vmem>>, vector<1x4x14xbf16>
    %11 = vector.shape_cast %10 : vector<1x4x14xbf16> to vector<4x14xbf16>
    %c1_12 = arith.constant 1 : index
    %c0_13 = arith.constant 0 : index
    %c2_14 = arith.constant 2 : index
    %12 = vector.load %arg1[%c1_12, %c0_13, %c2_14] : memref<2x4x16xbf16, #tpu.memory_space<vmem>>, vector<1x4x14xbf16>
    %13 = vector.shape_cast %12 : vector<1x4x14xbf16> to vector<4x14xbf16>
    %14 = tpu.concatenate %11, %13 in 1 : vector<4x14xbf16>, vector<4x14xbf16> -> vector<4x28xbf16>
    %15 = tpu.concatenate %4, %9, %14 in 0 : vector<4x28xbf16>, vector<4x28xbf16>, vector<4x28xbf16> -> vector<12x28xbf16>
    %c0_15 = arith.constant 0 : index
    %c0_16 = arith.constant 0 : index
    %16 = vector.load %arg2[%c0_15, %c0_16] : memref<8x12xbf16, #tpu.memory_space<vmem>>, vector<8x12xbf16>
    %cst = arith.constant dense<0.000000e+00> : vector<8x28xf32>
    %17 = tpu.matmul %16, %15, %cst {dimension_numbers = #tpu.dot_dimension_numbers<[1], [0], [0], [1], [0, 0, 1, 1], [], []>} : vector<8x12xbf16>, vector<12x28xbf16>, vector<8x28xf32> -> vector<8x28xf32>
    %cst_17 = arith.constant 0.00999999977 : f32
    %18 = vector.broadcast %cst_17 : f32 to vector<8x28xf32>
    %19 = arith.mulf %18, %17 : vector<8x28xf32>
    %20 = arith.maximumf %17, %19 : vector<8x28xf32>
    %c0_18 = arith.constant 0 : index
    %c0_19 = arith.constant 0 : index
    %c0_20 = arith.constant 0 : index
    %21 = vector.load %arg3[%c0_18, %c0_19, %c0_20] : memref<1x8x28xf32, #tpu.memory_space<vmem>>, vector<1x8x28xf32>
    %22 = vector.shape_cast %21 : vector<1x8x28xf32> to vector<8x28xf32>
    %23 = vector.shape_cast %20 : vector<8x28xf32> to vector<1x8x28xf32>
    tpu.vector_store %arg3[%c0_18, %c0_19, %c0_20], %23 {strides = array<i32>} : memref<1x8x28xf32, #tpu.memory_space<vmem>>, vector<1x8x28xf32>,
    return
  }
  func.func @transform_0(%arg0: i32) -> (i32, i32, i32) {
    %c0_i32 = arith.constant 0 : i32
    %c0_i32_0 = arith.constant 0 : i32
    %c0_i32_1 = arith.constant 0 : i32
    return %arg0, %c0_i32, %c0_i32_0 : i32, i32, i32
  }
  func.func @transform_1(%arg0: i32) -> (i32, i32) {
    %c0_i32 = arith.constant 0 : i32
    %c0_i32_0 = arith.constant 0 : i32
    %c0_i32_1 = arith.constant 0 : i32
    return %c0_i32, %c0_i32_0 : i32, i32
  }
  func.func @transform_2(%arg0: i32) -> (i32, i32, i32) {
    %c0_i32 = arith.constant 0 : i32
    %c0_i32_0 = arith.constant 0 : i32
    %c0_i32_1 = arith.constant 0 : i32
    return %arg0, %c0_i32, %c0_i32_0 : i32, i32, i32
  }
}

</mosaic_0001>

<bundles_post_ra>
// kernel: tpu_custom_call.1
= control target key start
LH: loop header
LB: loop body
LE: loop exit
PB: predicated region body
PF: predicated region fallthrough
CT: control target
= control target key end

     0   :  { %7 = vsyncpa [#allocation3], 0  ;;  %s315_s0 = inlined_call_operand.hbm [shape: bf16[2,4,16], index: 0, kind: input, shape index: {}]   ;;  %s316_s1 = inlined_call_operand.hbm [shape: bf16[8,12], index: 1, kind: input, shape index: {}]   ;;  %s317_s2 = inlined_call_operand.hbm [shape: f32[1,8,28], index: 2, kind: output, shape index: {}]  }
   0x1   :  { %8 = vsyncpa [#allocation6], 0 }
   0x2   :  { %9 = vsyncpa [#allocation4], 0  ;;  %s251_s9 = smov [#allocation2]   ;;  %s179_s13 = scalar_lea.hbm %s315_s0, 64 }
   0x3   :  { %s15_s10 = sshll.u32 %s251_s9, 4  ;;  %p180_p0 = scmp.ne.s32.totalorder %s315_s0, %s179_s13  ;;  %s16_s10 = int_to_ptr.vmem [resolvable:$true] %s15_s10 }
   0x4   :  { %p183_p1 = scmp.lt.u32.totalorder %s179_s13, %s315_s0 }
   0x6   :  { %p185_p2 = pnand %p183_p1, %p180_p0 }
   0x8   :  { %188 = shalt.err (!%p185_p2)
}
   0x9   :  { %s189_s18 = scalar_lea.vmem %s16_s10, 64  ;;  %p194_p4 = scmp.lt.s32.totalorder %s16_s10, %s16_s10 }
   0xa   :  { %p190_p3 = scmp.ne.s32.totalorder %s16_s10, %s189_s18  ;;  %p195_p5 = scmp.lt.s32.totalorder %s189_s18, %s189_s18 }
   0xc   :  { %p196_p6 = por %p195_p5, %p194_p4 }
   0xe   :  { %p197_p7 = pnand %p196_p6, %p190_p3 }
  0x10   :  { %200 = shalt.err (!%p197_p7)
}
  0x11   :  { %s252_s19 = smov 32   ;;  %s253_s20 = smov 2  }
  0x12   :  { %21 = dma.hbm_to_vmem [thread:$0]  %s315_s0, 64, %s16_s10, [#allocation3], %s252_s19, %s252_s19, %s253_s20  }
  0x13   :  { %s254_s23 = smov [#allocation5]   ;;  %s201_s27 = scalar_lea.hbm %s316_s1, 64 }
  0x14   :  { %s28_s24 = sshll.u32 %s254_s23, 4  ;;  %p202_p8 = scmp.ne.s32.totalorder %s316_s1, %s201_s27  ;;  %s29_s24 = int_to_ptr.vmem [resolvable:$true] %s28_s24 }
  0x15   :  { %p205_p9 = scmp.lt.u32.totalorder %s201_s27, %s316_s1 }
  0x17   :  { %p207_p10 = pnand %p205_p9, %p202_p8 }
  0x19   :  { %210 = shalt.err (!%p207_p10)
}
  0x1a   :  { %s211_s4 = scalar_lea.vmem %s29_s24, 64  ;;  %p216_p12 = scmp.lt.s32.totalorder %s29_s24, %s29_s24 }
  0x1b   :  { %p212_p11 = scmp.ne.s32.totalorder %s29_s24, %s211_s4  ;;  %p217_p13 = scmp.lt.s32.totalorder %s211_s4, %s211_s4 }
  0x1d   :  { %p218_p0 = por %p217_p13, %p216_p12 }
  0x1f   :  { %p219_p1 = pnand %p218_p0, %p212_p11 }
  0x21   :  { %222 = shalt.err (!%p219_p1)
}
  0x22   :  { %31 = dma.hbm_to_vmem [thread:$0]  %s316_s1, 64, %s29_s24, [#allocation6]  }
  0x23   :  { %245 = dma.done.wait [#allocation3], 64  }
  0x24   :  { %246 = vsyncadd [#allocation3], 4294967232 }
  0x25   :  { %247 = dma.done.wait [#allocation6], 64  }
  0x26   :  { %248 = vsyncadd [#allocation6], 4294967232  ;;  %v60_v0 = vlaneseq  ;;  %v255_v1 = vmov 1983009808   ;;  %v256_v5 = vmov 0.0   ;;  %s257_s6 = smov 13  }
  0x27   :  { %v58_v2 = vunpack.c.l.s4 %v255_v1  ;;  %160 = vmatprep.subr.bf16.mxu0 %v256_v5  ;;  %v156_v7 = vld.sshfl [vmem:[#allocation2 + $0x2] sm:$0x3 pattern:$0x76325410]  ;;  %v39_v8 = vld [vmem:[#allocation2] sm:$0x3] }
  0x28   :  { %v61_v3 = vshrl.u32 %v60_v0, 7  ;;  %66 = vrot.lane.b32.xlu0 %v156_v7, %s257_s6  ;;  %vm258_vm0 = vmmov 0   ;;  %s259_s1 = smov 126   ;;  %s260_s7 = smov 127   ;;  %vm52_vm1 = vcmask 113664   ;;  %vm82_vm2 = vcmask 1041408  }
  0x29   :  { %v59_v4 = vunpack.c.0.s8 %v58_v2  ;;  %162 = vmatprep.mubr.msk.bf16.mxu0 %vm258_vm0, %v256_v5  ;;  %s261_s8 = smov 12   ;;  %s262_s9 = smov 14   ;;  %vm85_vm3 = vcmask 1043456   ;;  %vm93_vm4 = vcmask 1045504   ;;  %v88_v23 = vld [vmem:[#allocation5] sm:$0xf] }
  0x2a   :  { %vm89_vm5 = vcmask 97280   ;;  %s263_s10 = smov [#allocation7]   ;;  %vm138_vm6 = vcmask 228352  }
  0x2b   :  { %v62_v6 = vsub.s32 %v59_v4, %v61_v3  ;;  %s146_s11 = sshll.u32 %s263_s10, 4  ;;  %s147_s11 = int_to_ptr.vmem [resolvable:$true] %s146_s11 }
  0x2c   :  { %s223_s12 = scalar_lea.vmem %s147_s11, 128  ;;  %p228_p3 = scmp.lt.s32.totalorder %s147_s11, %s147_s11 }
  0x2d   :  { %v63_v9 = vrot.slane %v39_v8, %v62_v6  ;;  %p224_p2 = scmp.ne.s32.totalorder %s147_s11, %s223_s12  ;;  %p229_p4 = scmp.lt.s32.totalorder %s223_s12, %s223_s12 }
  0x2f   :  { %71 = vrot.lane.b32.xlu1 %v63_v9, %s259_s1  ;;  %64 = vrot.lane.b32.xlu0 %v63_v9, %s260_s7  ;;  %p230_p5 = por %p229_p4, %p228_p3 }
  0x31   :  { %p231_p6 = pnand %p230_p5, %p224_p2 }
  0x33   :  { %73 = vrot.lane.b32.xlu1 %v156_v7, %s261_s8  ;;  %50 = vrot.lane.b32.xlu0 %v156_v7, %s262_s9 }
  0x9a   :  { %v67_v10 = vpop.permute.xlu0 %66 }
  0xa1   :  { %v72_v11 = vpop.permute.xlu1 %71  ;;  %v65_v12 = vpop.permute.xlu0 %64 }
  0xa2   :  { %v70_v13 = vsel %vm52_vm1, %v65_v12, %v67_v10 }
  0xa3   :  { %v79_v16 = vrot.slane %v70_v13, 6 }
  0xa5   :  { %v74_v14 = vpop.permute.xlu1 %73  ;;  %v51_v18 = vpop.permute.xlu0 %50 }
  0xa6   :  { %v77_v15 = vsel %vm52_vm1, %v72_v11, %v74_v14  ;;  %v55_v19 = vsel %vm52_vm1, %v39_v8, %v51_v18 }
  0xa7   :  { %v81_v17 = vrot.slane %v77_v15, 4  ;;  %v84_v20 = vsel %vm82_vm2, %v55_v19, %v79_v16 }
  0xa9   :  { %v87_v21 = vsel %vm85_vm3, %v84_v20, %v81_v17 }
  0xaa   :  { %v94_v22 = vsel %vm93_vm4, %v87_v21, 0 }
  0xab   :  { %161 = vmatpush3.bf16.msra.mxu0 %v94_v22 }
  0xae   :  { %163 = vmatmul.mubr.msk.bf16.vlgmr.msra.gmra.mrb[0].mxu0 %vm89_vm5, %v88_v23 }
 0x181   :  { %v130_v24 = vpop.f32.mrb[0].mxu0 }
 0x182   :  { %v136_v25 = vmul.f32 0.01, %v130_v24  ;;  %v164_v26 = vpop.f32.mrb[1].mxu0 }
 0x183   :  { %v133_v27 = vpop.f32.mrb[2].mxu0 }
 0x184   :  { %v137_v28 = vmax.f32 %v130_v24, %v136_v25  ;;  %v165_v29 = vpop.f32.mrb[3].mxu0 }
 0x186   :  { %139 = vst.msk [vmem:[#allocation7] sm:$0xff] %vm138_vm6, %v137_v28 }
 0x187   :  { %234 = shalt.err (!%p231_p6)
}
 0x188   :  { %s235_s15 = scalar_lea.hbm %s317_s2, 128 }
 0x189   :  { %p236_p7 = scmp.ne.s32.totalorder %s317_s2, %s235_s15  ;;  %p239_p8 = scmp.lt.u32.totalorder %s235_s15, %s317_s2 }
 0x18b   :  { %p241_p9 = pnand %p239_p8, %p236_p7 }
 0x18d   :  { %244 = shalt.err (!%p241_p9)
}
 0x18e   :  { %149 = dma.vmem_to_hbm [thread:$0]  %s147_s11, 128, %s317_s2, [#allocation4]  }
 0x18f   :  { %249 = dma.done.wait [#allocation4], 128  }
 0x190   :  { %250 = vsyncadd [#allocation4], 4294967168 }
 0x191   :  { %153 = vsyncpa [#allocation3], 1 }
 0x192   :  { %154 = vsyncpa [#allocation6], 1 }
 0x193   :  { %155 = vsyncpa [#allocation4], 1 }

</bundles_post_ra>
